<compile_context>
chip_gen: v5e
topology: v5e:2x2
jax: 0.10.0
libtpu: 0.0.40
codegen_flags: <defaults>
</compile_context>

<pallas_src>
import functools

import jax
import jax.numpy as jnp
from jax.experimental import pallas as pl
from jax.experimental.pallas import tpu as pltpu

HIDDEN = 64       # Actor hidden width (fc1/fc2/fc3 output features)
LANE = 128        # TPU lane width (last dim of a vreg)
SUBLANE = 8       # f32 sublane granularity
MAX_TILE_B = 1024 # batch-tile cap (per review: 512-1024 rows amortizes per-step overhead)


def _round_up(n, m):
    return ((n + m - 1) // m) * m


def _actor_kernel(x_ref, w1_ref, ws_ref, bs_ref, out_ref, *, max_action):
    """Fused Actor MLP: 3x (Linear + ReLU) -> Linear -> tanh -> (* max_action).

    Matmuls run on the MXU in the weights' dtype (bf16) with f32 accumulation;
    bias add, ReLU and tanh stay in f32. All N dims are 128-lane dense and the
    batch tile is a multiple of 8 sublanes, so every store is a full, unmasked
    vreg op. Zero padding of K/N dims stays exactly 0 through ReLU and
    contributes 0 downstream, so it is semantically inert.
    """
    mm_dtype = w1_ref.dtype
    f32 = jnp.float32

    x = x_ref[...].astype(mm_dtype)                                   # (tb, D_pad)
    h = jnp.dot(x, w1_ref[...], preferred_element_type=f32) + bs_ref[0]
    h = jnp.maximum(h, 0.0)
    h = jnp.dot(h.astype(mm_dtype), ws_ref[0], preferred_element_type=f32) + bs_ref[1]
    h = jnp.maximum(h, 0.0)
    h = jnp.dot(h.astype(mm_dtype), ws_ref[1], preferred_element_type=f32) + bs_ref[2]
    h = jnp.maximum(h, 0.0)
    a = jnp.dot(h.astype(mm_dtype), ws_ref[2], preferred_element_type=f32) + bs_ref[3]
    a = jnp.tanh(a)
    if max_action != 1.0:          # trace-time specialization: skip multiply when scale is 1
        a = max_action * a
    out_ref[...] = a.astype(out_ref.dtype)


def make_params(key, obs_dim, action_dim, hidden=HIDDEN):
    """PyTorch-layout Linear params: weight (out, in), bias (out,), default init."""
    def lin(k, fan_in, fan_out):
        kw, kb = jax.random.split(k)
        s = 1.0 / jnp.sqrt(jnp.float32(fan_in))
        w = jax.random.uniform(kw, (fan_out, fan_in), jnp.float32, -s, s)
        b = jax.random.uniform(kb, (fan_out,), jnp.float32, -s, s)
        return w, b

    k1, k2, k3, k4 = jax.random.split(key, 4)
    return (lin(k1, obs_dim, hidden),     # fc1
            lin(k2, hidden, hidden),      # fc2
            lin(k3, hidden, hidden),      # fc3
            lin(k4, hidden, action_dim))  # action_out


def pack_params(params, weight_dtype=jnp.bfloat16):
    """Transpose (out,in)->(in,out), pad, cast weights, and stack operands.

    Returns:
      w1p:      (D_pad, 128)   weight_dtype   fc1 weight; K padded only to the
                                               sublane/packing granularity (16 for
                                               bf16, 8 for f32) — NOT to 128.
      w_stack:  (3, 128, 128)  weight_dtype   fc2 / fc3 / action_out weights.
      b_stack:  (4, 1, 128)    float32        fc1 / fc2 / fc3 / action_out biases.
    """
    (w1, b1), (w2, b2), (w3, b3), (wo, bo) = params

    k_gran = 16 if jnp.dtype(weight_dtype).itemsize < 4 else SUBLANE
    obs_dim = w1.shape[1]
    d_pad = _round_up(obs_dim, k_gran)

    def pad_w(w, in_p, out_p):
        wt = w.T                                   # (in, out)
        return (jnp.zeros((in_p, out_p), jnp.float32)
                .at[:wt.shape[0], :wt.shape[1]].set(wt)
                .astype(weight_dtype))

    def pad_b(b, out_p):
        return jnp.zeros((1, out_p), jnp.float32).at[0, :b.shape[0]].set(b)

    w1p = pad_w(w1, d_pad, LANE)
    w_stack = jnp.stack([pad_w(w2, LANE, LANE),
                         pad_w(w3, LANE, LANE),
                         pad_w(wo, LANE, LANE)])                        # (3,128,128)
    b_stack = jnp.stack([pad_b(b1, LANE), pad_b(b2, LANE),
                         pad_b(b3, LANE), pad_b(bo, LANE)])             # (4,1,128)
    return w1p, w_stack, b_stack


def actor_forward(x, fake_hidden, c, packed, max_action, action_dim):
    """Pallas Actor forward; returns (actions, fake_hidden, c) like the nn.Module."""
    w1p, w_stack, b_stack = packed
    B, D = x.shape
    D_pad = w1p.shape[0]
    H_pad = w1p.shape[1]          # 128
    A_pad = w_stack.shape[2]      # 128

    # Batch tile: multiple of 8 sublanes, capped at 1024 rows. Small batches get a single
    # block covering the whole (padded) batch; large batches get a multi-step "parallel"
    # grid (shards across TensorCores on v7x once it has >= 2 steps).
    tile_b = min(MAX_TILE_B, _round_up(max(B, 1), SUBLANE))
    B_pad = _round_up(B, tile_b)
    grid = (B_pad // tile_b,)

    # Sublane/lane-dense input slab; zero padding is inert (see kernel docstring).
    x_p = jnp.zeros((B_pad, D_pad), jnp.float32).at[:B, :D].set(x)

    itemsize = lambda a: a.size * a.dtype.itemsize
    flops = 2 * B_pad * (D_pad * H_pad + 2 * H_pad * H_pad + H_pad * A_pad)
    bytes_accessed = (itemsize(x_p) + itemsize(w1p) + itemsize(w_stack)
                      + itemsize(b_stack) + B_pad * A_pad * 4)

    out_p = pl.pallas_call(
        functools.partial(_actor_kernel, max_action=float(max_action)),
        out_shape=jax.ShapeDtypeStruct((B_pad, A_pad), jnp.float32),
        grid=grid,
        in_specs=[
            pl.BlockSpec((tile_b, D_pad), lambda i: (i, 0)),     # x batch tile
            pl.BlockSpec(w1p.shape, lambda i: (0, 0)),           # fc1 weight (resident)
            pl.BlockSpec(w_stack.shape, lambda i: (0, 0, 0)),    # fc2/fc3/out weights
            pl.BlockSpec(b_stack.shape, lambda i: (0, 0, 0)),    # all biases (f32)
        ],
        out_specs=pl.BlockSpec((tile_b, A_pad), lambda i: (i, 0)),
        compiler_params=pltpu.CompilerParams(
            dimension_semantics=("parallel",)),
        cost_estimate=pl.CostEstimate(
            flops=flops,
            transcendentals=B_pad * A_pad,
            bytes_accessed=bytes_accessed),
    )(x_p, w1p, w_stack, b_stack)

    actions = out_p[:B, :action_dim]
    # fake_hidden / c are untouched by the PyTorch module: pass through for free,
    # never routing them through HBM<->VMEM.
    return actions, fake_hidden, c


def actor_reference(x, fake_hidden, c, params, max_action, matmul_dtype=jnp.float32):
    """Pure-JAX reference mirroring the PyTorch forward.

    matmul_dtype=bf16 reproduces the kernel's quantized MXU path (f32 accumulation).
    """
    (w1, b1), (w2, b2), (w3, b3), (wo, bo) = params

    def layer(h, w, b):
        return jnp.dot(h.astype(matmul_dtype), w.T.astype(matmul_dtype),
                       preferred_element_type=jnp.float32) + b

    h = jnp.maximum(layer(x, w1, b1), 0.0)
    h = jnp.maximum(layer(h, w2, b2), 0.0)
    h = jnp.maximum(layer(h, w3, b3), 0.0)
    actions = max_action * jnp.tanh(layer(h, wo, bo))
    return actions, fake_hidden, c


if __name__ == "__main__":
    key = jax.random.PRNGKey(0)

    # MADDPG-style setup for one agent: obs_shape[agent_id]=6, action_shape[agent_id]=2.
    obs_dim = 6
    action_dim = 2
    max_action = 1.0          # args.high_action
    batch = 2

    k_p, k_x, k_h, k_c = jax.random.split(key, 4)
    params = make_params(k_p, obs_dim, action_dim)
    packed = pack_params(params, weight_dtype=jnp.bfloat16)   # bf16 MXU path (all gens)

    x = jax.random.normal(k_x, (batch, obs_dim), jnp.float32)
    fake_hidden = jax.random.normal(k_h, (batch, HIDDEN), jnp.float32)
    cell = jax.random.normal(k_c, (batch, HIDDEN), jnp.float32)

    actions, h_out, c_out = actor_forward(x, fake_hidden, cell, packed,
                                          max_action, action_dim)
    jax.block_until_ready((actions, h_out, c_out))

    # Tight check vs a pure-JAX reference using the same bf16-weight / f32-accum math.
    q_actions, q_h, q_c = actor_reference(x, fake_hidden, cell, params, max_action,
                                          matmul_dtype=jnp.bfloat16)
    # Loose check vs the full-f32 PyTorch-style reference (only bf16 rounding differs).
    f_actions, _, _ = actor_reference(x, fake_hidden, cell, params, max_action,
                                      matmul_dtype=jnp.float32)

    assert actions.shape == (batch, action_dim)
    assert jnp.allclose(actions, q_actions, atol=2e-3, rtol=2e-3), \
        float(jnp.max(jnp.abs(actions - q_actions)))
    assert jnp.allclose(actions, f_actions, atol=5e-2, rtol=5e-2), \
        float(jnp.max(jnp.abs(actions - f_actions)))
    assert jnp.array_equal(h_out, fake_hidden)
    assert jnp.array_equal(c_out, cell)

    print("KERNEL_OK")
</pallas_src>

<mosaic_0001>
module attributes {stable_mosaic.version = 11 : i64} {
  func.func @_actor_kernel(%arg0: i32, %arg1: memref<8x16xf32, #tpu.memory_space<vmem>>, %arg2: memref<16x128xbf16, #tpu.memory_space<vmem>>, %arg3: memref<3x128x128xbf16, #tpu.memory_space<vmem>>, %arg4: memref<4x1x128xf32, #tpu.memory_space<vmem>>, %arg5: memref<8x128xf32, #tpu.memory_space<vmem>>) attributes {dimension_semantics = [#tpu.dimension_semantics<parallel>], iteration_bounds = array<i64: 1>, scalar_prefetch = 0 : i64, scratch_operands = 0 : i64, tpu.core_type = #tpu.core_type<tc>, window_params = [{transform_indices = @transform_0, window_bounds = array<i64: 8, 16>}, {pipeline_mode = #tpu.pipeline_mode<synchronous>, transform_indices = @transform_1, window_bounds = array<i64: 16, 128>}, {pipeline_mode = #tpu.pipeline_mode<synchronous>, transform_indices = @transform_2, window_bounds = array<i64: 3, 128, 128>}, {pipeline_mode = #tpu.pipeline_mode<synchronous>, transform_indices = @transform_3, window_bounds = array<i64: 4, 1, 128>}, {transform_indices = @transform_4, window_bounds = array<i64: 8, 128>}]} {
    %c0 = arith.constant 0 : index
    %c0_0 = arith.constant 0 : index
    %0 = vector.load %arg1[%c0, %c0_0] : memref<8x16xf32, #tpu.memory_space<vmem>>, vector<8x16xf32>
    %1 = arith.truncf %0 : vector<8x16xf32> to vector<8x16xbf16>
    %c0_1 = arith.constant 0 : index
    %c0_2 = arith.constant 0 : index
    %2 = vector.load %arg2[%c0_1, %c0_2] : memref<16x128xbf16, #tpu.memory_space<vmem>>, vector<16x128xbf16>
    %cst = arith.constant dense<0.000000e+00> : vector<8x128xf32>
    %3 = tpu.matmul %1, %2, %cst {dimension_numbers = #tpu.dot_dimension_numbers<[1], [0], [0], [1], [0, 0, 1, 1], [], []>} : vector<8x16xbf16>, vector<16x128xbf16>, vector<8x128xf32> -> vector<8x128xf32>
    %c0_3 = arith.constant 0 : index
    %c0_4 = arith.constant 0 : index
    %c0_5 = arith.constant 0 : index
    %4 = vector.load %arg4[%c0_3, %c0_4, %c0_5] : memref<4x1x128xf32, #tpu.memory_space<vmem>>, vector<1x1x128xf32>
    %5 = vector.shape_cast %4 : vector<1x1x128xf32> to vector<1x128xf32>
    %6 = vector.broadcast %5 : vector<1x128xf32> to vector<8x128xf32>
    %7 = arith.addf %3, %6 : vector<8x128xf32>
    %cst_6 = arith.constant 0.000000e+00 : f32
    %8 = vector.broadcast %cst_6 : f32 to vector<8x128xf32>
    %9 = arith.maximumf %7, %8 : vector<8x128xf32>
    %10 = arith.truncf %9 : vector<8x128xf32> to vector<8x128xbf16>
    %c0_7 = arith.constant 0 : index
    %c0_8 = arith.constant 0 : index
    %c0_9 = arith.constant 0 : index
    %11 = vector.load %arg3[%c0_7, %c0_8, %c0_9] : memref<3x128x128xbf16, #tpu.memory_space<vmem>>, vector<1x128x128xbf16>
    %12 = vector.shape_cast %11 : vector<1x128x128xbf16> to vector<128x128xbf16>
    %cst_10 = arith.constant dense<0.000000e+00> : vector<8x128xf32>
    %13 = tpu.matmul %10, %12, %cst_10 {dimension_numbers = #tpu.dot_dimension_numbers<[1], [0], [0], [1], [0, 0, 1, 1], [], []>} : vector<8x128xbf16>, vector<128x128xbf16>, vector<8x128xf32> -> vector<8x128xf32>
    %c1 = arith.constant 1 : index
    %c0_11 = arith.constant 0 : index
    %c0_12 = arith.constant 0 : index
    %14 = vector.load %arg4[%c1, %c0_11, %c0_12] : memref<4x1x128xf32, #tpu.memory_space<vmem>>, vector<1x1x128xf32>
    %15 = vector.shape_cast %14 : vector<1x1x128xf32> to vector<1x128xf32>
    %16 = vector.broadcast %15 : vector<1x128xf32> to vector<8x128xf32>
    %17 = arith.addf %13, %16 : vector<8x128xf32>
    %cst_13 = arith.constant 0.000000e+00 : f32
    %18 = vector.broadcast %cst_13 : f32 to vector<8x128xf32>
    %19 = arith.maximumf %17, %18 : vector<8x128xf32>
    %20 = arith.truncf %19 : vector<8x128xf32> to vector<8x128xbf16>
    %c1_14 = arith.constant 1 : index
    %c0_15 = arith.constant 0 : index
    %c0_16 = arith.constant 0 : index
    %21 = vector.load %arg3[%c1_14, %c0_15, %c0_16] : memref<3x128x128xbf16, #tpu.memory_space<vmem>>, vector<1x128x128xbf16>
    %22 = vector.shape_cast %21 : vector<1x128x128xbf16> to vector<128x128xbf16>
    %cst_17 = arith.constant dense<0.000000e+00> : vector<8x128xf32>
    %23 = tpu.matmul %20, %22, %cst_17 {dimension_numbers = #tpu.dot_dimension_numbers<[1], [0], [0], [1], [0, 0, 1, 1], [], []>} : vector<8x128xbf16>, vector<128x128xbf16>, vector<8x128xf32> -> vector<8x128xf32>
    %c2 = arith.constant 2 : index
    %c0_18 = arith.constant 0 : index
    %c0_19 = arith.constant 0 : index
    %24 = vector.load %arg4[%c2, %c0_18, %c0_19] : memref<4x1x128xf32, #tpu.memory_space<vmem>>, vector<1x1x128xf32>
    %25 = vector.shape_cast %24 : vector<1x1x128xf32> to vector<1x128xf32>
    %26 = vector.broadcast %25 : vector<1x128xf32> to vector<8x128xf32>
    %27 = arith.addf %23, %26 : vector<8x128xf32>
    %cst_20 = arith.constant 0.000000e+00 : f32
    %28 = vector.broadcast %cst_20 : f32 to vector<8x128xf32>
    %29 = arith.maximumf %27, %28 : vector<8x128xf32>
    %30 = arith.truncf %29 : vector<8x128xf32> to vector<8x128xbf16>
    %c2_21 = arith.constant 2 : index
    %c0_22 = arith.constant 0 : index
    %c0_23 = arith.constant 0 : index
    %31 = vector.load %arg3[%c2_21, %c0_22, %c0_23] : memref<3x128x128xbf16, #tpu.memory_space<vmem>>, vector<1x128x128xbf16>
    %32 = vector.shape_cast %31 : vector<1x128x128xbf16> to vector<128x128xbf16>
    %cst_24 = arith.constant dense<0.000000e+00> : vector<8x128xf32>
    %33 = tpu.matmul %30, %32, %cst_24 {dimension_numbers = #tpu.dot_dimension_numbers<[1], [0], [0], [1], [0, 0, 1, 1], [], []>} : vector<8x128xbf16>, vector<128x128xbf16>, vector<8x128xf32> -> vector<8x128xf32>
    %c3 = arith.constant 3 : index
    %c0_25 = arith.constant 0 : index
    %c0_26 = arith.constant 0 : index
    %34 = vector.load %arg4[%c3, %c0_25, %c0_26] : memref<4x1x128xf32, #tpu.memory_space<vmem>>, vector<1x1x128xf32>
    %35 = vector.shape_cast %34 : vector<1x1x128xf32> to vector<1x128xf32>
    %36 = vector.broadcast %35 : vector<1x128xf32> to vector<8x128xf32>
    %37 = arith.addf %33, %36 : vector<8x128xf32>
    %38 = math.tanh %37 : vector<8x128xf32>
    %c0_27 = arith.constant 0 : index
    %c0_28 = arith.constant 0 : index
    %39 = vector.load %arg5[%c0_27, %c0_28] : memref<8x128xf32, #tpu.memory_space<vmem>>, vector<8x128xf32>
    tpu.vector_store %arg5[%c0_27, %c0_28], %38 {strides = array<i32>} : memref<8x128xf32, #tpu.memory_space<vmem>>, vector<8x128xf32>,
    return
  }
  func.func @transform_0(%arg0: i32) -> (i32, i32) {
    %c0_i32 = arith.constant 0 : i32
    %c0_i32_0 = arith.constant 0 : i32
    return %arg0, %c0_i32 : i32, i32
  }
  func.func @transform_1(%arg0: i32) -> (i32, i32) {
    %c0_i32 = arith.constant 0 : i32
    %c0_i32_0 = arith.constant 0 : i32
    %c0_i32_1 = arith.constant 0 : i32
    return %c0_i32, %c0_i32_0 : i32, i32
  }
  func.func @transform_2(%arg0: i32) -> (i32, i32, i32) {
    %c0_i32 = arith.constant 0 : i32
    %c0_i32_0 = arith.constant 0 : i32
    %c0_i32_1 = arith.constant 0 : i32
    %c0_i32_2 = arith.constant 0 : i32
    return %c0_i32, %c0_i32_0, %c0_i32_1 : i32, i32, i32
  }
  func.func @transform_3(%arg0: i32) -> (i32, i32, i32) {
    %c0_i32 = arith.constant 0 : i32
    %c0_i32_0 = arith.constant 0 : i32
    %c0_i32_1 = arith.constant 0 : i32
    %c0_i32_2 = arith.constant 0 : i32
    return %c0_i32, %c0_i32_0, %c0_i32_1 : i32, i32, i32
  }
  func.func @transform_4(%arg0: i32) -> (i32, i32) {
    %c0_i32 = arith.constant 0 : i32
    %c0_i32_0 = arith.constant 0 : i32
    return %arg0, %c0_i32 : i32, i32
  }
}

</mosaic_0001>

<bundles_post_ra>
// kernel: tpu_custom_call.1
= control target key start
LH: loop header
LB: loop body
LE: loop exit
PB: predicated region body
PF: predicated region fallthrough
CT: control target
= control target key end

     0   :  { %9 = vsyncpa [#allocation3], 0  ;;  %s704_s0 = inlined_call_operand.hbm [shape: f32[8,16], index: 0, kind: input, shape index: {}]   ;;  %s705_s1 = inlined_call_operand.hbm [shape: bf16[16,128], index: 1, kind: input, shape index: {}]   ;;  %s706_s2 = inlined_call_operand.hbm [shape: bf16[3,128,128], index: 2, kind: input, shape index: {}]   ;;  %s707_s3 = inlined_call_operand.hbm [shape: f32[4,1,128], index: 3, kind: input, shape index: {}]   ;;  %s708_s4 = inlined_call_operand.hbm [shape: f32[8,128], index: 4, kind: output, shape index: {}]  }
   0x1   :  { %10 = vsyncpa [#allocation6], 0 }
   0x2   :  { %11 = vsyncpa [#allocation9], 0  ;;  %s28_s17 = sshll.u32 %s705_s1, 4  ;;  %s29_s17 = int_to_ptr.hbm [resolvable:$true] %s28_s17 }
   0x3   :  { %12 = vsyncpa [#allocation4], 0  ;;  %s655_s18 = smov [#allocation5]   ;;  %s18_s22 = sshll.u32 %s704_s0, 4  ;;  %s19_s22 = int_to_ptr.hbm [resolvable:$true] %s18_s22 }
   0x4   :  { %s30_s19 = sshll.u32 %s655_s18, 4  ;;  %s656_s23 = smov 64   ;;  %s31_s19 = int_to_ptr.vmem [resolvable:$true] %s30_s19 }
   0x5   :  { %s657_s24 = smov 4   ;;  %s658_s25 = smov [#allocation2]  }
   0x6   :  { %36 = dma.hbm_to_vmem [thread:$0]  %s29_s17, 128, %s31_s19, [#allocation6], %s656_s23, %s656_s23, %s657_s24  }
   0x7   :  { %s20_s26 = sshll.u32 %s658_s25, 4  ;;  %s41_s29 = sshll.u32 %s706_s2, 4  ;;  %s21_s26 = int_to_ptr.vmem [resolvable:$true] %s20_s26  ;;  %s42_s29 = int_to_ptr.hbm [resolvable:$true] %s41_s29 }
   0x8   :  { %23 = dma.hbm_to_vmem [thread:$0]  %s19_s22, 128, %s21_s26, [#allocation3]  }
   0x9   :  { %s54_s5 = sshll.u32 %s707_s3, 4  ;;  %s659_s6 = smov [#allocation7]   ;;  %s55_s5 = int_to_ptr.hbm [resolvable:$true] %s54_s5 }
   0xa   :  { %s43_s7 = sshll.u32 %s659_s6, 4  ;;  %s660_s0 = smov [#allocation8]   ;;  %s44_s7 = int_to_ptr.vmem [resolvable:$true] %s43_s7 }
   0xb   :  { %49 = dma.hbm_to_vmem [thread:$0]  %s42_s29, 3072, %s44_s7, [#allocation6], %s656_s23, %s656_s23, %s657_s24  }
   0xc   :  { %s56_s8 = sshll.u32 %s660_s0, 4  ;;  %s661_s9 = smov 16   ;;  %s57_s8 = int_to_ptr.vmem [resolvable:$true] %s56_s8 }
   0xd   :  { %s662_s10 = smov 1  }
   0xe   :  { %62 = dma.hbm_to_vmem [thread:$0]  %s55_s5, 64, %s57_s8, [#allocation9], %s661_s9, %s661_s9, %s662_s10  }
   0xf   :  { %647 = dma.done.wait [#allocation3], 128  }
  0x10   :  { %648 = vsyncadd [#allocation3], 4294967168 }
  0x11   :  { %649 = dma.done.wait [#allocation6], 3200  }
  0x12   :  { %650 = vsyncadd [#allocation6], 4294964096 }
  0x13   :  { %651 = dma.done.wait [#allocation9], 64  }
  0x14   :  { %652 = vsyncadd [#allocation9], 4294967232  ;;  %v487_v0 = vld [vmem:[#allocation5] sm:$0xff]  ;;  %v80_v1 = vld [vmem:[#allocation2] sm:$0xff]  ;;  %vm94_vm0 = vcmask 130048   ;;  %s663_s2 = smov [#allocation10]  }
  0x15   :  { %v495_v2 = vld [vmem:[#allocation7 + $0x38] sm:$0xff]  ;;  %v81_v3 = vpack.c.bf16 %v80_v1, %v80_v1  ;;  %105 = vmatpush.bf16.msra.mxu0 %v487_v0  ;;  %v494_v4 = vld [vmem:[#allocation7 + $0x30] sm:$0xff]  ;;  %v493_v5 = vld [vmem:[#allocation7 + $0x28] sm:$0xff]  ;;  %s372_s3 = sshll.u32 %s663_s2, 4  ;;  %s374_s13 = sshll.u32 %s708_s4, 4  ;;  %s373_s3 = int_to_ptr.vmem [resolvable:$true] %s372_s3  ;;  %s375_s13 = int_to_ptr.hbm [resolvable:$true] %s374_s13 }
  0x16   :  { %182 = vmatpush.bf16.msra.mxu1 %v495_v2  ;;  %v492_v6 = vld [vmem:[#allocation7 + $0x20] sm:$0xff]  ;;  %v491_v7 = vld [vmem:[#allocation7 + $0x18] sm:$0xff]  ;;  %v490_v8 = vld [vmem:[#allocation7 + $0x10] sm:$0xff] }
  0x17   :  { %v489_v9 = vld [vmem:[#allocation7 + $0x8] sm:$0xff]  ;;  %v488_v10 = vld [vmem:[#allocation7] sm:$0xff]  ;;  %v503_v11 = vld [vmem:[#allocation7 + $0x78] sm:$0xff] }
  0x18   :  { %390 = vmatmul.msk.bf16.vlgmr.msra.gmra.mxu0 %vm94_vm0, %v81_v3  ;;  %267 = vmatpush.bf16.msra.mxu2 %v503_v11  ;;  %v502_v12 = vld [vmem:[#allocation7 + $0x70] sm:$0xff]  ;;  %v501_v13 = vld [vmem:[#allocation7 + $0x68] sm:$0xff]  ;;  %v500_v14 = vld [vmem:[#allocation7 + $0x60] sm:$0xff] }
  0x19   :  { %v499_v15 = vld [vmem:[#allocation7 + $0x58] sm:$0xff]  ;;  %v498_v16 = vld [vmem:[#allocation7 + $0x50] sm:$0xff]  ;;  %v521_v17 = vld [vmem:[#allocation8] ss:$0 sm:$0xff] }
  0x1a   :  { %183 = vmatpush.bf16.msra.mxu1 %v494_v4  ;;  %v497_v23 = vld [vmem:[#allocation7 + $0x48] sm:$0xff]  ;;  %v496_v24 = vld [vmem:[#allocation7 + $0x40] sm:$0xff]  ;;  %v511_v25 = vld [vmem:[#allocation7 + $0xb8] sm:$0xff] }
  0x1b   :  { %352 = vmatpush.bf16.msra.mxu3 %v511_v25  ;;  %v510_v26 = vld [vmem:[#allocation7 + $0xb0] sm:$0xff]  ;;  %v509_v27 = vld [vmem:[#allocation7 + $0xa8] sm:$0xff]  ;;  %v508_v28 = vld [vmem:[#allocation7 + $0xa0] sm:$0xff] }
  0x1c   :  { %268 = vmatpush.bf16.msra.mxu2 %v502_v12  ;;  %v507_v29 = vld [vmem:[#allocation7 + $0x98] sm:$0xff]  ;;  %v506_v30 = vld [vmem:[#allocation7 + $0x90] sm:$0xff]  ;;  %v522_v31 = vld [vmem:[#allocation8 + $0x1] ss:$0 sm:$0xff] }
  0x1d   :  { %v505_v37 = vld [vmem:[#allocation7 + $0x88] sm:$0xff]  ;;  %v504_v38 = vld [vmem:[#allocation7 + $0x80] sm:$0xff] }
  0x1e   :  { %184 = vmatpush.bf16.msra.mxu1 %v493_v5  ;;  %v523_v39 = vld [vmem:[#allocation8 + $0x2] ss:$0 sm:$0xff]  ;;  %v524_v45 = vld [vmem:[#allocation8 + $0x3] ss:$0 sm:$0xff] }
  0x1f   :  { %353 = vmatpush.bf16.msra.mxu3 %v510_v26 }
  0x20   :  { %269 = vmatpush.bf16.msra.mxu2 %v501_v13 }
  0x22   :  { %185 = vmatpush.bf16.msra.mxu1 %v492_v6 }
  0x23   :  { %354 = vmatpush.bf16.msra.mxu3 %v509_v27 }
  0x24   :  { %270 = vmatpush.bf16.msra.mxu2 %v500_v14 }
  0x26   :  { %186 = vmatpush.bf16.msra.mxu1 %v491_v7 }
  0x27   :  { %355 = vmatpush.bf16.msra.mxu3 %v508_v28 }
  0x28   :  { %271 = vmatpush.bf16.msra.mxu2 %v499_v15 }
  0x2a   :  { %187 = vmatpush.bf16.msra.mxu1 %v490_v8 }
  0x2b   :  { %356 = vmatpush.bf16.msra.mxu3 %v507_v29 }
  0x2c   :  { %272 = vmatpush.bf16.msra.mxu2 %v498_v16 }
  0x2e   :  { %188 = vmatpush.bf16.msra.mxu1 %v489_v9 }
  0x2f   :  { %357 = vmatpush.bf16.msra.mxu3 %v506_v30 }
  0x30   :  { %273 = vmatpush.bf16.msra.mxu2 %v497_v23 }
  0x32   :  { %189 = vmatpush.bf16.msra.mxu1 %v488_v10 }
  0x33   :  { %358 = vmatpush.bf16.msra.mxu3 %v505_v37 }
  0x34   :  { %274 = vmatpush.bf16.msra.mxu2 %v496_v24 }
  0x37   :  { %359 = vmatpush.bf16.msra.mxu3 %v504_v38 }
  0x95   :  { %v107_v18 = vpop.f32.mrf.mxu0 }
  0x96   :  { %v108_v19 = vadd.f32 %v521_v17, %v107_v18 }
  0x98   :  { %v111_v20 = vmax.f32 %v108_v19, 0.0 }
  0x9a   :  { %v112_v21 = vpack.c.bf16 %v111_v20, %v111_v20 }
  0x9c   :  { %190 = vmatmul.bf16.vlgmr.msra.gmra.mxu1 %v112_v21 }
  0x9d   :  { %v109_v22 = vpop.f32.mrf.mxu0 }
 0x119   :  { %v191_v32 = vpop.f32.mrf.mxu1 }
 0x11a   :  { %v192_v33 = vadd.f32 %v522_v31, %v191_v32 }
 0x11c   :  { %v195_v34 = vmax.f32 %v192_v33, 0.0 }
 0x11e   :  { %v196_v35 = vpack.c.bf16 %v195_v34, %v195_v34 }
 0x120   :  { %275 = vmatmul.bf16.vlgmr.msra.gmra.mxu2 %v196_v35 }
 0x121   :  { %v193_v36 = vpop.f32.mrf.mxu1 }
 0x1a3   :  { %v276_v40 = vpop.f32.mrf.mxu2 }
 0x1a4   :  { %v277_v41 = vadd.f32 %v523_v39, %v276_v40 }
 0x1a6   :  { %v280_v42 = vmax.f32 %v277_v41, 0.0 }
 0x1a8   :  { %v281_v43 = vpack.c.bf16 %v280_v42, %v280_v42 }
 0x1aa   :  { %360 = vmatmul.bf16.vlgmr.msra.gmra.mxu3 %v281_v43 }
 0x1ab   :  { %v278_v44 = vpop.f32.mrf.mxu2 }
 0x22d   :  { %v361_v46 = vpop.f32.mrf.mxu3 }
 0x22e   :  { %v362_v47 = vadd.f32 %v524_v45, %v361_v46 }
 0x230   :  { %525 = vtanh.f32 %v362_v47 }
 0x235   :  { %v363_v48 = vpop.f32.mrf.mxu3 }
 0x236   :  { %v526_v49 = vpop.eup %525 }
 0x237   :  { %366 = vst [vmem:[#allocation10] sm:$0xff] %v526_v49 }
 0x238   :  { %377 = dma.vmem_to_hbm [thread:$0]  %s373_s3, 128, %s375_s13, [#allocation4]  }
 0x239   :  { %653 = dma.done.wait [#allocation4], 128  }
 0x23a   :  { %654 = vsyncadd [#allocation4], 4294967168 }
 0x23b   :  { %382 = vsyncpa [#allocation3], 1 }
 0x23c   :  { %383 = vsyncpa [#allocation6], 1 }
 0x23d   :  { %384 = vsyncpa [#allocation9], 1 }
 0x23e   :  { %385 = vsyncpa [#allocation4], 1 }

</bundles_post_ra>
